<compile_context>
chip_gen: v6e
topology: v6e:2x2x1
jax: 0.10.0
libtpu: 0.0.40
codegen_flags: <defaults>
</compile_context>

<pallas_src>
import functools

import jax
import jax.numpy as jnp
from jax.experimental import pallas as pl
from jax.experimental.pallas import tpu as pltpu

OUT_LANES = 128  # lane-dense padded output width (must hold A actions + 1 value)


def _round_up(x, m):
    return ((x + m - 1) // m) * m


def _tpu_defaults():
    """Per-chip tiling defaults (tm_max, #TensorCores, scoped-VMEM limit)."""
    kind = ""
    try:
        kind = jax.devices()[0].device_kind.lower()
    except Exception:  # pragma: no cover - defensive, e.g. no devices yet
        pass
    if "v7" in kind:
        # 2 TCs/chip, 64 MiB physical VMEM per TC -> keep default 32 MiB scoped.
        return {"tm_max": 4096, "num_tc": 2, "vmem_limit": None}
    if "v5" in kind and ("lite" in kind or "5e" in kind):
        # 16 MiB default scoped VMEM; cap tm at 2048 and raise the limit.
        return {"tm_max": 2048, "num_tc": 1, "vmem_limit": 64 * 1024 * 1024}
    # v6e (and default): 1 TC, 128 MiB physical VMEM.
    return {"tm_max": 4096, "num_tc": 1, "vmem_limit": 64 * 1024 * 1024}


def actor_critic_kernel(x_ref, w12_ref, b12_ref, wh_ref, bh_ref, out_ref, *,
                        num_actions):
    # Fused hidden layer: one 128-lane matmul instead of two 64-lane ones.
    # MXU operands in the weights' dtype (bf16 in the perf path); accumulation
    # and all subsequent VPU math in f32.
    w12 = w12_ref[...]                                                 # (D, H)
    x = x_ref[...].astype(w12.dtype)                                   # (TM, D)
    h = jnp.dot(x, w12, preferred_element_type=jnp.float32) + b12_ref[...]
    h = jnp.maximum(h, 0.0)                                            # ReLU (both branches)

    # Fused (block-diagonal) actor+value head, padded to 128 output lanes.
    wh = wh_ref[...]                                                   # (H, 128)
    head = (jnp.dot(h.astype(wh.dtype), wh, preferred_element_type=jnp.float32)
            + bh_ref[...])                                             # (TM, 128) f32

    # (1, 128) lane index; broadcast in the compares (no (TM,128) iota vregs).
    lane = jax.lax.broadcasted_iota(jnp.int32, (1, OUT_LANES), 1)

    # Masked, numerically-stable softmax over the first `num_actions` lanes.
    logits = jnp.where(lane < num_actions, head, -jnp.inf)
    m = jnp.max(logits, axis=-1, keepdims=True)
    e = jnp.exp(logits - m)                                            # 0 on masked lanes
    denom = jnp.sum(e, axis=-1, keepdims=True)
    probs = e * pl.reciprocal(denom, approx=True)                      # EUP slot

    # Lane-dense slab: probs in lanes < A, value in lane A, zeros elsewhere.
    out = jnp.where(lane == num_actions, head, probs)
    out_ref[...] = out.astype(out_ref.dtype)


def fuse_params(params, *, mxu_dtype=jnp.bfloat16, out_dtype=jnp.bfloat16):
    """Pre-fuse the four Linear layers into two lane-dense matmul operands.

    Call once; reuse across forward passes.  `mxu_dtype` is the dtype of the
    matmul operands (bf16 = MXU-native on v5e/v6e/v7x; f32 = exact semantics).
    Biases and all VPU math stay f32 regardless.
    """
    w1, b1 = params["w1"], params["b1"]          # (D, fc1), (1, fc1)
    w2, b2 = params["w2"], params["b2"]          # (D, fc2), (1, fc2)
    wa, ba = params["wa"], params["ba"]          # (fc1, A), (1, A)
    wv, bv = params["wv"], params["bv"]          # (fc2, 1), (1, 1)

    fc1 = w1.shape[1]
    fc2 = w2.shape[1]
    A = wa.shape[1]
    assert A + 1 <= OUT_LANES, "action_size + 1 must fit in 128 output lanes"

    w12 = jnp.concatenate([w1, w2], axis=1)      # (D, fc1+fc2)
    b12 = jnp.concatenate([b1, b2], axis=1)      # (1, fc1+fc2)

    wh = jnp.zeros((fc1 + fc2, OUT_LANES), jnp.float32)
    wh = wh.at[:fc1, :A].set(wa)                 # actor block (uses h1)
    wh = wh.at[fc1:, A].set(wv[:, 0])            # value column (uses h2)

    bh = jnp.zeros((1, OUT_LANES), jnp.float32)
    bh = bh.at[:, :A].set(ba)
    bh = bh.at[:, A].set(bv[:, 0])

    return {"w12": w12.astype(mxu_dtype),
            "b12": b12.astype(jnp.float32),
            "wh": wh.astype(mxu_dtype),
            "bh": bh.astype(jnp.float32),
            "num_actions": A,
            "out_dtype": out_dtype}


def actor_critic_forward(state, fused, *, tm_max=None):
    """state: (B, D) float32.  fused: output of fuse_params()."""
    B, D = state.shape
    A = fused["num_actions"]
    H = fused["w12"].shape[1]
    out_dtype = fused["out_dtype"]

    cfg = _tpu_defaults()
    if tm_max is None:
        tm_max = cfg["tm_max"]
    num_tc = cfg["num_tc"]

    # Batch tiling:
    #  * big tiles (2048/4096) amortize the ~0.35 us per-grid-step overhead,
    #  * on multi-TC chips (v7x) force >=2 blocks once B is big enough so the
    #    "parallel" batch axis shards across both TensorCores,
    #  * weights stay VMEM-resident across grid steps via constant index_maps.
    if num_tc > 1 and B > 64:
        tm_target = _round_up(pl.cdiv(B, num_tc), 8)
    else:
        tm_target = _round_up(B, 8)
    tm = max(8, min(tm_max, tm_target))
    b_pad = _round_up(B, tm)
    x = state if b_pad == B else jnp.pad(state, ((0, b_pad - B), (0, 0)))

    out = pl.pallas_call(
        functools.partial(actor_critic_kernel, num_actions=A),
        out_shape=jax.ShapeDtypeStruct((b_pad, OUT_LANES), out_dtype),
        grid_spec=pltpu.PrefetchScalarGridSpec(
            num_scalar_prefetch=0,
            grid=(b_pad // tm,),
            in_specs=[
                pl.BlockSpec((tm, D), lambda i: (i, 0)),          # state tile
                pl.BlockSpec((D, H), lambda i: (0, 0)),           # fused W12 (resident)
                pl.BlockSpec((1, H), lambda i: (0, 0)),           # fused b12 (resident)
                pl.BlockSpec((H, OUT_LANES), lambda i: (0, 0)),   # fused head W (resident)
                pl.BlockSpec((1, OUT_LANES), lambda i: (0, 0)),   # fused head b (resident)
            ],
            out_specs=pl.BlockSpec((tm, OUT_LANES), lambda i: (i, 0)),
        ),
        compiler_params=pltpu.CompilerParams(
            dimension_semantics=("parallel",),
            vmem_limit_bytes=cfg["vmem_limit"]),
    )(x, fused["w12"], fused["b12"], fused["wh"], fused["bh"])

    # TODO(synk): for tiny-B single-step inference the call is launch-bound;
    # fusing action sampling / log-prob / entropy (pltpu.prng_*) into this
    # kernel would help more than any tiling change, but is out of scope for
    # keeping forward() == (action_probs, state_value).
    probs = out[:B, :A].astype(jnp.float32)
    value = out[:B, A:A + 1].astype(jnp.float32)
    return probs, value


def init_params(key, input_shape, action_size, fc1, fc2):
    """Deterministic PyTorch-style uniform init (U[-1/sqrt(fan_in), 1/sqrt(fan_in)])."""
    ks = jax.random.split(key, 8)

    def lin(kw, kb, fan_in, fan_out):
        bound = 1.0 / jnp.sqrt(fan_in)
        w = jax.random.uniform(kw, (fan_in, fan_out), jnp.float32, -bound, bound)
        b = jax.random.uniform(kb, (1, fan_out), jnp.float32, -bound, bound)
        return w, b

    w1, b1 = lin(ks[0], ks[1], input_shape, fc1)
    wa, ba = lin(ks[2], ks[3], fc1, action_size)
    w2, b2 = lin(ks[4], ks[5], input_shape, fc2)
    wv, bv = lin(ks[6], ks[7], fc2, 1)
    return {"w1": w1, "b1": b1, "wa": wa, "ba": ba,
            "w2": w2, "b2": b2, "wv": wv, "bv": bv}


def reference_forward(state, p):
    h1 = jnp.maximum(state @ p["w1"] + p["b1"], 0.0)
    probs = jax.nn.softmax(h1 @ p["wa"] + p["ba"], axis=-1)
    h2 = jnp.maximum(state @ p["w2"] + p["b2"], 0.0)
    value = h2 @ p["wv"] + p["bv"]
    return probs, value


if __name__ == "__main__":
    # LunarLander-ish small config: 8-dim state, 4 actions, hidden 64/64, batch 8.
    B, INPUT, ACTIONS, FC1, FC2 = 8, 8, 4, 64, 64

    key = jax.random.PRNGKey(0)
    k_state, k_params, k_big = jax.random.split(key, 3)
    state = jax.random.normal(k_state, (B, INPUT), jnp.float32)
    params = init_params(k_params, INPUT, ACTIONS, FC1, FC2)
    ref_probs, ref_value = reference_forward(state, params)

    # --- exact f32 path (bit-faithful to the PyTorch module semantics) -------
    fused_f32 = fuse_params(params, mxu_dtype=jnp.float32, out_dtype=jnp.float32)
    probs, value = actor_critic_forward(state, fused_f32)
    jax.block_until_ready((probs, value))
    assert probs.shape == (B, ACTIONS) and value.shape == (B, 1)
    assert jnp.allclose(probs, ref_probs, atol=2e-3), "actor mismatch (f32)"
    assert jnp.allclose(value, ref_value, atol=1e-4), "critic mismatch (f32)"
    assert jnp.allclose(jnp.sum(probs, axis=-1), 1.0, atol=2e-3), "softmax not normalized"

    # --- perf path: bf16 MXU operands + bf16 lane-dense output slab ----------
    fused_bf16 = fuse_params(params)  # defaults: bf16 MXU operands, bf16 output
    probs_b, value_b = actor_critic_forward(state, fused_bf16)
    jax.block_until_ready((probs_b, value_b))
    assert jnp.allclose(probs_b, ref_probs, atol=1e-2), "actor mismatch (bf16)"
    assert jnp.allclose(value_b, ref_value, atol=1e-2), "critic mismatch (bf16)"
    assert jnp.allclose(jnp.sum(probs_b, axis=-1), 1.0, atol=1e-2), "softmax not normalized (bf16)"

    # --- larger, non-multiple batch: exercises padding + multi-step grid -----
    B2 = 200
    state2 = jax.random.normal(k_big, (B2, INPUT), jnp.float32)
    probs2, value2 = actor_critic_forward(state2, fused_bf16, tm_max=64)
    jax.block_until_ready((probs2, value2))
    ref_probs2, ref_value2 = reference_forward(state2, params)
    assert probs2.shape == (B2, ACTIONS) and value2.shape == (B2, 1)
    assert jnp.allclose(probs2, ref_probs2, atol=1e-2), "actor mismatch (grid)"
    assert jnp.allclose(value2, ref_value2, atol=1e-2), "critic mismatch (grid)"
    assert jnp.allclose(jnp.sum(probs2, axis=-1), 1.0, atol=1e-2), "softmax not normalized (grid)"

    print("KERNEL_OK")
</pallas_src>

<mosaic_0001>
module attributes {stable_mosaic.version = 11 : i64} {
  func.func @actor_critic_kernel(%arg0: i32, %arg1: memref<8x8xf32, #tpu.memory_space<vmem>>, %arg2: memref<8x128xf32, #tpu.memory_space<vmem>>, %arg3: memref<1x128xf32, #tpu.memory_space<vmem>>, %arg4: memref<128x128xf32, #tpu.memory_space<vmem>>, %arg5: memref<1x128xf32, #tpu.memory_space<vmem>>, %arg6: memref<8x128xf32, #tpu.memory_space<vmem>>) attributes {dimension_semantics = [#tpu.dimension_semantics<parallel>], iteration_bounds = array<i64: 1>, scalar_prefetch = 0 : i64, scratch_operands = 0 : i64, tpu.core_type = #tpu.core_type<tc>, window_params = [{transform_indices = @transform_0, window_bounds = array<i64: 8, 8>}, {pipeline_mode = #tpu.pipeline_mode<synchronous>, transform_indices = @transform_1, window_bounds = array<i64: 8, 128>}, {pipeline_mode = #tpu.pipeline_mode<synchronous>, transform_indices = @transform_2, window_bounds = array<i64: 1, 128>}, {pipeline_mode = #tpu.pipeline_mode<synchronous>, transform_indices = @transform_3, window_bounds = array<i64: 128, 128>}, {pipeline_mode = #tpu.pipeline_mode<synchronous>, transform_indices = @transform_4, window_bounds = array<i64: 1, 128>}, {transform_indices = @transform_5, window_bounds = array<i64: 8, 128>}]} {
    %c0 = arith.constant 0 : index
    %c0_0 = arith.constant 0 : index
    %0 = vector.load %arg2[%c0, %c0_0] : memref<8x128xf32, #tpu.memory_space<vmem>>, vector<8x128xf32>
    %c0_1 = arith.constant 0 : index
    %c0_2 = arith.constant 0 : index
    %1 = vector.load %arg1[%c0_1, %c0_2] : memref<8x8xf32, #tpu.memory_space<vmem>>, vector<8x8xf32>
    %cst = arith.constant dense<0.000000e+00> : vector<8x128xf32>
    %2 = tpu.matmul %1, %0, %cst {dimension_numbers = #tpu.dot_dimension_numbers<[1], [0], [0], [1], [0, 0, 1, 1], [], []>} : vector<8x8xf32>, vector<8x128xf32>, vector<8x128xf32> -> vector<8x128xf32>
    %c0_3 = arith.constant 0 : index
    %c0_4 = arith.constant 0 : index
    %3 = vector.load %arg3[%c0_3, %c0_4] : memref<1x128xf32, #tpu.memory_space<vmem>>, vector<1x128xf32>
    %4 = vector.broadcast %3 : vector<1x128xf32> to vector<8x128xf32>
    %5 = arith.addf %2, %4 : vector<8x128xf32>
    %cst_5 = arith.constant 0.000000e+00 : f32
    %6 = vector.broadcast %cst_5 : f32 to vector<8x128xf32>
    %7 = arith.maximumf %5, %6 : vector<8x128xf32>
    %c0_6 = arith.constant 0 : index
    %c0_7 = arith.constant 0 : index
    %8 = vector.load %arg4[%c0_6, %c0_7] : memref<128x128xf32, #tpu.memory_space<vmem>>, vector<128x128xf32>
    %cst_8 = arith.constant dense<0.000000e+00> : vector<8x128xf32>
    %9 = tpu.matmul %7, %8, %cst_8 {dimension_numbers = #tpu.dot_dimension_numbers<[1], [0], [0], [1], [0, 0, 1, 1], [], []>} : vector<8x128xf32>, vector<128x128xf32>, vector<8x128xf32> -> vector<8x128xf32>
    %c0_9 = arith.constant 0 : index
    %c0_10 = arith.constant 0 : index
    %10 = vector.load %arg5[%c0_9, %c0_10] : memref<1x128xf32, #tpu.memory_space<vmem>>, vector<1x128xf32>
    %11 = vector.broadcast %10 : vector<1x128xf32> to vector<8x128xf32>
    %12 = arith.addf %9, %11 : vector<8x128xf32>
    %13 = tpu.iota {dimensions = array<i32: 1>} : vector<1x128xi32>
    %c4_i32 = arith.constant 4 : i32
    %14 = vector.broadcast %c4_i32 : i32 to vector<1x128xi32>
    %15 = arith.cmpi slt, %13, %14 : vector<1x128xi32>
    %cst_11 = arith.constant 0xFF800000 : f32
    %16 = vector.shape_cast %15 : vector<1x128xi1> to vector<1x128xi1>
    %17 = vector.broadcast %16 : vector<1x128xi1> to vector<8x128xi1>
    %18 = vector.broadcast %cst_11 : f32 to vector<8x128xf32>
    %19 = arith.select %17, %12, %18 : vector<8x128xi1>, vector<8x128xf32>
    %cst_12 = arith.constant dense<0xFF800000> : vector<8xf32>
    %20 = vector.multi_reduction <maximumf>, %19, %cst_12 [1] : vector<8x128xf32> to vector<8xf32>
    %21 = vector.shape_cast %20 : vector<8xf32> to vector<8x1xf32>
    %22 = vector.broadcast %21 : vector<8x1xf32> to vector<8x128xf32>
    %23 = arith.subf %19, %22 : vector<8x128xf32>
    %24 = math.exp %23 : vector<8x128xf32>
    %cst_13 = arith.constant dense<0.000000e+00> : vector<8xf32>
    %25 = vector.multi_reduction <add>, %24, %cst_13 [1] : vector<8x128xf32> to vector<8xf32>
    %26 = vector.shape_cast %25 : vector<8xf32> to vector<8x1xf32>
    %27 = tpu.reciprocal %26 {approx = true} : vector<8x1xf32> -> vector<8x1xf32>
    %28 = vector.broadcast %27 : vector<8x1xf32> to vector<8x128xf32>
    %29 = arith.mulf %24, %28 : vector<8x128xf32>
    %c4_i32_14 = arith.constant 4 : i32
    %30 = vector.broadcast %c4_i32_14 : i32 to vector<1x128xi32>
    %31 = arith.cmpi eq, %13, %30 : vector<1x128xi32>
    %32 = vector.shape_cast %31 : vector<1x128xi1> to vector<1x128xi1>
    %33 = vector.broadcast %32 : vector<1x128xi1> to vector<8x128xi1>
    %34 = arith.select %33, %12, %29 : vector<8x128xi1>, vector<8x128xf32>
    %c0_15 = arith.constant 0 : index
    %c0_16 = arith.constant 0 : index
    %35 = vector.load %arg6[%c0_15, %c0_16] : memref<8x128xf32, #tpu.memory_space<vmem>>, vector<8x128xf32>
    tpu.vector_store %arg6[%c0_15, %c0_16], %34 {strides = array<i32>} : memref<8x128xf32, #tpu.memory_space<vmem>>, vector<8x128xf32>,
    return
  }
  func.func @transform_0(%arg0: i32) -> (i32, i32) {
    %c0_i32 = arith.constant 0 : i32
    %c0_i32_0 = arith.constant 0 : i32
    return %arg0, %c0_i32 : i32, i32
  }
  func.func @transform_1(%arg0: i32) -> (i32, i32) {
    %c0_i32 = arith.constant 0 : i32
    %c0_i32_0 = arith.constant 0 : i32
    %c0_i32_1 = arith.constant 0 : i32
    return %c0_i32, %c0_i32_0 : i32, i32
  }
  func.func @transform_2(%arg0: i32) -> (i32, i32) {
    %c0_i32 = arith.constant 0 : i32
    %c0_i32_0 = arith.constant 0 : i32
    %c0_i32_1 = arith.constant 0 : i32
    return %c0_i32, %c0_i32_0 : i32, i32
  }
  func.func @transform_3(%arg0: i32) -> (i32, i32) {
    %c0_i32 = arith.constant 0 : i32
    %c0_i32_0 = arith.constant 0 : i32
    %c0_i32_1 = arith.constant 0 : i32
    return %c0_i32, %c0_i32_0 : i32, i32
  }
  func.func @transform_4(%arg0: i32) -> (i32, i32) {
    %c0_i32 = arith.constant 0 : i32
    %c0_i32_0 = arith.constant 0 : i32
    %c0_i32_1 = arith.constant 0 : i32
    return %c0_i32, %c0_i32_0 : i32, i32
  }
  func.func @transform_5(%arg0: i32) -> (i32, i32) {
    %c0_i32 = arith.constant 0 : i32
    %c0_i32_0 = arith.constant 0 : i32
    return %arg0, %c0_i32 : i32, i32
  }
}

</mosaic_0001>

<bundles_post_ra>
// kernel: tpu_custom_call.1
= control target key start
LH: loop header
LB: loop body
LE: loop exit
PB: predicated region body
PF: predicated region fallthrough
CT: control target
= control target key end

     0   :  { %10 = vsyncpa [#allocation3], 0  ;;  %s487_s0 = inlined_call_operand.hbm [shape: f32[8,8], index: 0, kind: input, shape index: {}]   ;;  %s488_s1 = inlined_call_operand.hbm [shape: f32[8,128], index: 1, kind: input, shape index: {}]   ;;  %s489_s2 = inlined_call_operand.vmem [shape: f32[1,128], index: 2, kind: input, shape index: {}]   ;;  %s490_s3 = inlined_call_operand.hbm [shape: f32[128,128], index: 3, kind: input, shape index: {}]   ;;  %s491_s4 = inlined_call_operand.vmem [shape: f32[1,128], index: 4, kind: input, shape index: {}]   ;;  %s492_s5 = inlined_call_operand.hbm [shape: f32[8,128], index: 5, kind: output, shape index: {}]  }
   0x1   :  { %11 = vsyncpa [#allocation6], 0 }
   0x2   :  { %12 = vsyncpa [#allocation4], 0  ;;  %s431_s18 = smov [#allocation5]   ;;  %s432_s20 = smov [#allocation2]  }
   0x3   :  { %s29_s19 = sshll.u32 %s431_s18, 4  ;;  %s19_s21 = sshll.u32 %s432_s20, 4  ;;  %s30_s19 = int_to_ptr.vmem [resolvable:$true] %s29_s19  ;;  %s20_s21 = int_to_ptr.vmem [resolvable:$true] %s19_s21 }
   0x4   :  { %s353_s22 = scalar_lea.vmem %s30_s19, 128  ;;  %p358_p1 = scmp.lt.s32.totalorder %s30_s19, %s30_s19 }
   0x5   :  { %p354_p0 = scmp.ne.s32.totalorder %s30_s19, %s353_s22  ;;  %p359_p2 = scmp.lt.s32.totalorder %s353_s22, %s353_s22 }
   0x7   :  { %p360_p3 = por %p359_p2, %p358_p1 }
   0x9   :  { %p361_p4 = pnand %p360_p3, %p354_p0 }
   0xb   :  { %364 = shalt.err (!%p361_p4)
}
   0xc   :  { %32 = dma.hbm_to_vmem [thread:$0]  %s488_s1, 128, %s30_s19, [#allocation6]  }
   0xd   :  { %s373_s25 = scalar_lea.vmem %s20_s21, 128  ;;  %p378_p6 = scmp.lt.s32.totalorder %s20_s21, %s20_s21 }
   0xe   :  { %p374_p5 = scmp.ne.s32.totalorder %s20_s21, %s373_s25  ;;  %p379_p7 = scmp.lt.s32.totalorder %s373_s25, %s373_s25 }
  0x10   :  { %p380_p8 = por %p379_p7, %p378_p6 }
  0x12   :  { %p381_p9 = pnand %p380_p8, %p374_p5 }
  0x14   :  { %384 = shalt.err (!%p381_p9)
}
  0x15   :  { %22 = dma.hbm_to_vmem [thread:$0]  %s487_s0, 128, %s20_s21, [#allocation3]  }
  0x16   :  { %s433_s28 = smov [#allocation7]  }
  0x17   :  { %s40_s29 = sshll.u32 %s433_s28, 4  ;;  %s41_s29 = int_to_ptr.vmem [resolvable:$true] %s40_s29 }
  0x18   :  { %s393_s30 = scalar_lea.vmem %s41_s29, 2048  ;;  %p398_p11 = scmp.lt.s32.totalorder %s41_s29, %s41_s29 }
  0x19   :  { %p394_p10 = scmp.ne.s32.totalorder %s41_s29, %s393_s30  ;;  %p399_p12 = scmp.lt.s32.totalorder %s393_s30, %s393_s30 }
  0x1b   :  { %p400_p13 = por %p399_p12, %p398_p11 }
  0x1d   :  { %p401_p0 = pnand %p400_p13, %p394_p10 }
  0x1f   :  { %404 = shalt.err (!%p401_p0)
}
  0x20   :  { %s434_s1 = smov 128   ;;  %s435_s6 = smov 8  }
  0x21   :  { %46 = dma.hbm_to_vmem [thread:$0]  %s490_s3, 2048, %s41_s29, [#allocation6], %s434_s1, %s434_s1, %s435_s6  }
  0x22   :  { %425 = dma.done.wait [#allocation3], 128  }
  0x23   :  { %426 = vsyncadd [#allocation3], 4294967168 }
  0x24   :  { %427 = dma.done.wait [#allocation6], 2176  }
  0x25   :  { %428 = vsyncadd [#allocation6], 4294965120  ;;  %v436_v0 = vmov 0.0   ;;  %vm437_vm0 = vmmov 0   ;;  %vm67_vm1 = vcmask 64512   ;;  %v58_v1 = vld [vmem:[#allocation5] sm:$0xff]  ;;  %v235_v24 = vlaneseq }
  0x26   :  { %293 = vmatprep.subr.mxu0 %v436_v0  ;;  %295 = vmatprep.mubr.msk.f32.mxu0 %vm437_vm0, %v436_v0  ;;  %v59_v2 = vld [vmem:[#allocation2] sm:$0xff]  ;;  %v157_v3 = vld [vmem:[#allocation7 + $0x78] sm:$0xff]  ;;  %v155_v5 = vld [vmem:[#allocation7 + $0x68] sm:$0xff] }
  0x27   :  { %298 = vmatprep.subr.mxu1 %v436_v0  ;;  %330 = vmatprep.mubr.msk.f32.mxu1 %vm437_vm0, %v436_v0  ;;  %v156_v4 = vld [vmem:[#allocation7 + $0x70] sm:$0xff]  ;;  %v154_v6 = vld [vmem:[#allocation7 + $0x60] sm:$0xff]  ;;  %v153_v7 = vld [vmem:[#allocation7 + $0x58] sm:$0xff]  ;;  %v236_v25 = vand.u32 127, %v235_v24 }
  0x28   :  { %294 = vmatpush3.msra.mxu0 %v58_v1  ;;  %299 = vmatpush3.msra.mxu1 %v157_v3  ;;  %v152_v8 = vld [vmem:[#allocation7 + $0x50] sm:$0xff]  ;;  %v151_v9 = vld [vmem:[#allocation7 + $0x48] sm:$0xff]  ;;  %v150_v10 = vld [vmem:[#allocation7 + $0x40] sm:$0xff] }
  0x29   :  { %296 = vmatmul.mubr.msk.f32.vlgmr.msra.gmra.mxu0 %vm67_vm1, %v59_v2  ;;  %300 = vmatprep.subr.mxu1 %v436_v0  ;;  %v149_v11 = vld [vmem:[#allocation7 + $0x38] sm:$0xff]  ;;  %v148_v12 = vld [vmem:[#allocation7 + $0x30] sm:$0xff]  ;;  %v147_v13 = vld [vmem:[#allocation7 + $0x28] sm:$0xff]  ;;  %vm237_vm2 = vcmp.lt.s32.totalorder %v236_v25, 4  ;;  %vm250_vm3 = vcmp.eq.s32.totalorder %v236_v25, 4 }
  0x2a   :  { %301 = vmatpush3.msra.mxu1 %v156_v4  ;;  %v146_v14 = vld [vmem:[#allocation7 + $0x20] sm:$0xff]  ;;  %v145_v15 = vld [vmem:[#allocation7 + $0x18] sm:$0xff]  ;;  %v144_v16 = vld [vmem:[#allocation7 + $0x10] sm:$0xff] }
  0x2b   :  { %302 = vmatprep.subr.mxu1 %v436_v0  ;;  %v143_v17 = vld [vmem:[#allocation7 + $0x8] sm:$0xff]  ;;  %v142_v18 = vld [vmem:[#allocation7] sm:$0xff]  ;;  %v271_v19 = vld [vmem:[%s489_s2] ss:$0 sm:$0xff]  ;;  %s438_s2 = smov [#allocation8]  }
  0x2c   :  { %303 = vmatpush3.msra.mxu1 %v155_v5  ;;  %v273_v26 = vld [vmem:[%s491_s4] ss:$0 sm:$0xff]  ;;  %s261_s11 = sshll.u32 %s438_s2, 4  ;;  %s262_s11 = int_to_ptr.vmem [resolvable:$true] %s261_s11 }
  0x2d   :  { %304 = vmatprep.subr.mxu1 %v436_v0  ;;  %s405_s4 = scalar_lea.vmem %s262_s11, 128  ;;  %p410_p2 = scmp.lt.s32.totalorder %s262_s11, %s262_s11 }
  0x2e   :  { %305 = vmatpush3.msra.mxu1 %v154_v6  ;;  %p406_p1 = scmp.ne.s32.totalorder %s262_s11, %s405_s4  ;;  %p411_p3 = scmp.lt.s32.totalorder %s405_s4, %s405_s4 }
  0x2f   :  { %306 = vmatprep.subr.mxu1 %v436_v0 }
  0x30   :  { %307 = vmatpush3.msra.mxu1 %v153_v7  ;;  %p412_p4 = por %p411_p3, %p410_p2 }
  0x31   :  { %308 = vmatprep.subr.mxu1 %v436_v0 }
  0x32   :  { %309 = vmatpush3.msra.mxu1 %v152_v8  ;;  %p413_p5 = pnand %p412_p4, %p406_p1 }
  0x33   :  { %310 = vmatprep.subr.mxu1 %v436_v0 }
  0x34   :  { %311 = vmatpush3.msra.mxu1 %v151_v9 }
  0x35   :  { %312 = vmatprep.subr.mxu1 %v436_v0 }
  0x36   :  { %313 = vmatpush3.msra.mxu1 %v150_v10 }
  0x37   :  { %314 = vmatprep.subr.mxu1 %v436_v0 }
  0x38   :  { %315 = vmatpush3.msra.mxu1 %v149_v11 }
  0x39   :  { %316 = vmatprep.subr.mxu1 %v436_v0 }
  0x3a   :  { %317 = vmatpush3.msra.mxu1 %v148_v12 }
  0x3b   :  { %318 = vmatprep.subr.mxu1 %v436_v0 }
  0x3c   :  { %319 = vmatpush3.msra.mxu1 %v147_v13 }
  0x3d   :  { %320 = vmatprep.subr.mxu1 %v436_v0 }
  0x3e   :  { %321 = vmatpush3.msra.mxu1 %v146_v14 }
  0x3f   :  { %322 = vmatprep.subr.mxu1 %v436_v0 }
  0x40   :  { %323 = vmatpush3.msra.mxu1 %v145_v15 }
  0x41   :  { %324 = vmatprep.subr.mxu1 %v436_v0 }
  0x42   :  { %325 = vmatpush3.msra.mxu1 %v144_v16 }
  0x43   :  { %326 = vmatprep.subr.mxu1 %v436_v0 }
  0x44   :  { %327 = vmatpush3.msra.mxu1 %v143_v17 }
  0x45   :  { %328 = vmatprep.subr.mxu1 %v436_v0 }
  0x46   :  { %329 = vmatpush3.msra.mxu1 %v142_v18 }
  0xe9   :  { %v137_v20 = vpop.f32.mrf.mxu0 }
  0xea   :  { %v138_v21 = vadd.f32 %v271_v19, %v137_v20 }
  0xeb   :  { %v297_v22 = vpop.f32.mrf.mxu0 }
  0xec   :  { %v141_v23 = vmax.f32 %v138_v21, 0.0 }
  0xee   :  { %331 = vmatmul.mubr.f32.vlgmr.msra.gmra.mxu1 %v141_v23 }
 0x1ae   :  { %v231_v27 = vpop.f32.mrf.mxu1 }
 0x1af   :  { %v232_v28 = vadd.f32 %v273_v26, %v231_v27 }
 0x1b0   :  { %v332_v29 = vpop.f32.mrf.mxu1 }
 0x1b1   :  { %v240_v30 = vsel %vm237_vm2, %v232_v28, -inf }
 0x1b2   :  { %241 = vmax.xlane.f32.xlu0 %v240_v30 }
 0x23b   :  { %v242_v31 = vpop.xlane.xlu0 %241 }
 0x23c   :  { %v243_v32 = vsub.f32 %v240_v30, %v242_v31 }
 0x23e   :  { %v244_v33 = vmul.f32 1.442695, %v243_v32 }
 0x240   :  { %341 = vpow2.f32 %v244_v33 }
 0x24d   :  { %v342_v34 = vpop.eup %341 }
 0x24e   :  { %246 = vadd.xlane.f32.xlu0 %v342_v34 }
 0x2d7   :  { %v247_v35 = vpop.xlane.xlu0 %246 }
 0x2d8   :  { %343 = vrcp.f32 %v247_v35 }
 0x2e5   :  { %v344_v36 = vpop.eup %343 }
 0x2e6   :  { %v249_v37 = vmul.f32 %v344_v36, %v342_v34 }
 0x2e8   :  { %v253_v38 = vsel %vm250_vm3, %v232_v28, %v249_v37 }
 0x2e9   :  { %254 = vst [vmem:[#allocation8] sm:$0xff] %v253_v38 }
 0x2ea   :  { %416 = shalt.err (!%p413_p5)
}
 0x2eb   :  { %264 = dma.vmem_to_hbm [thread:$0]  %s262_s11, 128, %s492_s5, [#allocation4]  }
 0x2ec   :  { %429 = dma.done.wait [#allocation4], 128  }
 0x2ed   :  { %430 = vsyncadd [#allocation4], 4294967168 }
 0x2ee   :  { %268 = vsyncpa [#allocation3], 1 }
 0x2ef   :  { %269 = vsyncpa [#allocation6], 1 }
 0x2f0   :  { %270 = vsyncpa [#allocation4], 1 }

</bundles_post_ra>
